<compile_context>
chip_gen: v6e
topology: v6e:2x2x1
jax: 0.10.0
libtpu: 0.0.40
codegen_flags: <defaults>
</compile_context>

<pallas_src>
import functools

import jax
import jax.numpy as jnp
from jax.experimental import pallas as pl
from jax.experimental.pallas import tpu as pltpu

ALPHA = 3.0                            # matches AsymmetricMSELoss(alpha=3.0) default
LANES = 128
MAX_BLOCK_ROWS = 8192                  # (8192, 128) f32 = 4 MiB per input block
VMEM_LIMIT_BYTES = 48 * 1024 * 1024    # fits v7x 64 MiB/TC; raises v5e's 16 MiB scoped default
MIN_STEPS_PER_SPLIT = 3                # keep input DMA overlapped with compute on mid-size inputs


def _sublane_tile(*dtypes):
    """Minimum packed sublane tile: 8 rows for 4-byte, 16 for 2-byte, 32 for 1-byte dtypes."""
    t = 8
    for dt in dtypes:
        t = max(t, 32 // max(1, jnp.dtype(dt).itemsize))
    return t


def _num_tensorcores():
    """Best-effort TensorCores-per-chip (v7x=2, v5e/v6e=1). Falls back to 1 (always correct)."""
    try:
        info = pltpu.get_tpu_info()
        for name in ("num_cores", "core_count", "num_tensorcores",
                     "tensorcore_count", "cores_per_chip"):
            v = getattr(info, name, None)
            if v is not None:
                v = int(v)
                if v > 0:
                    return v
    except Exception:
        pass
    try:
        v = getattr(jax.local_devices()[0], "num_cores", None)
        if v is not None:
            v = int(v)
            if v > 0:
                return v
    except Exception:
        pass
    return 1


def _asym_mse_kernel(p_ref, t_ref, out_ref, *, alpha, block_rows,
                     chunks_per_split, valid_rows, needs_mask):
    """Accumulate per-split partial sums of where(e>0, alpha, 1)*e^2 into an (8,128) block."""
    k = pl.program_id(1)

    @pl.when(k == 0)
    def _():
        out_ref[...] = jnp.zeros_like(out_ref)

    err = p_ref[...].astype(jnp.float32) - t_ref[...].astype(jnp.float32)
    # Fold the alpha branch into a single multiply (one fewer full-width VPU mul).
    loss = err * err * jnp.where(err > 0, jnp.float32(alpha), jnp.float32(1.0))

    def _accumulate(x):
        # (block_rows, 128) -> (block_rows//8, 8, 128); summing axis 0 adds whole vregs
        # on the VALU (no cross-lane traffic until the wrapper's final reduce).
        out_ref[...] += x.reshape(-1, 8, LANES).sum(axis=0)

    if needs_mask:
        # Scalar predicate: only the partial last block and clamped out-of-range
        # duplicate blocks pay for the iota/compare/select; interior blocks stay
        # on the mask-free fast path (keeps the kernel mem-bound, not VALU-bound).
        c = pl.program_id(0)
        vb = c * chunks_per_split + k                  # virtual (unclamped) block index
        start = vb * block_rows
        is_edge = start + block_rows > valid_rows

        @pl.when(jnp.logical_not(is_edge))
        def _():
            _accumulate(loss)

        @pl.when(is_edge)
        def _():
            row = start + jax.lax.broadcasted_iota(jnp.int32, loss.shape, 0)
            _accumulate(jnp.where(row < valid_rows, loss, jnp.float32(0.0)))
    else:
        _accumulate(loss)


def _plain_sum(p, t, alpha):
    e = p.astype(jnp.float32) - t.astype(jnp.float32)
    return jnp.sum(e * e * jnp.where(e > 0, jnp.float32(alpha), jnp.float32(1.0)))


def asymmetric_mse_loss(pred, target, alpha=ALPHA):
    assert pred.shape == target.shape, "pred/target must have the same shape"
    n = pred.size

    # Flatten only (free for contiguous arrays); keep the native dtype so the kernel
    # streams the minimum number of HBM bytes.
    flat_p = pred.reshape(-1)
    flat_t = target.reshape(-1)

    tile = _sublane_tile(pred.dtype, target.dtype)
    n128 = (n // LANES) * LANES
    rows = n128 // LANES

    if rows < tile:
        # Too small for a packed-tile kernel; plain JAX is optimal here anyway.
        return _plain_sum(flat_p, flat_t, alpha) / jnp.float32(n)

    tail_sum = jnp.float32(0.0)
    if n128 < n:
        # Rare case (n not a multiple of 128): fold the <128-element tail in plain JAX.
        tail_sum = _plain_sum(flat_p[n128:], flat_t[n128:], alpha)
        flat_p = flat_p[:n128]
        flat_t = flat_t[:n128]

    p2 = flat_p.reshape(rows, LANES)
    t2 = flat_t.reshape(rows, LANES)

    nsplit = _num_tensorcores()

    # Block sizing: biggest block that (a) is a multiple of the dtype sublane tile,
    # (b) stays <= MAX_BLOCK_ROWS, and (c) leaves >= MIN_STEPS_PER_SPLIT steps per split
    # so DMA stays overlapped (a 1-step pipeline degenerates to load-then-compute).
    target_rows = max(tile, rows // max(1, nsplit * MIN_STEPS_PER_SPLIT))
    block_rows = min(MAX_BLOCK_ROWS, target_rows, rows)
    block_rows = max(tile, (block_rows // tile) * tile)

    nblocks = pl.cdiv(rows, block_rows)
    if nblocks < nsplit:
        nsplit = 1                                  # not enough blocks to shard across cores
    cps = pl.cdiv(nblocks, nsplit)                  # chunks (grid steps) per split

    needs_clamp = (nsplit * cps != nblocks)
    needs_mask = needs_clamp or (nblocks * block_rows != rows)

    if needs_clamp:
        in_map = lambda c, k: (jnp.minimum(c * cps + k, nblocks - 1), 0)
    else:
        in_map = lambda c, k: (c * cps + k, 0)

    kernel = functools.partial(
        _asym_mse_kernel,
        alpha=float(alpha),
        block_rows=block_rows,
        chunks_per_split=cps,
        valid_rows=rows,
        needs_mask=needs_mask,
    )

    bytes_accessed = (rows * LANES * (p2.dtype.itemsize + t2.dtype.itemsize)
                      + nsplit * 8 * LANES * 4)

    # TODO(synk): on v7x, if xprof shows exposed DMA at pipeline startup, sweep
    # pipeline_mode=pl.Buffered(3) on the two input BlockSpecs (VMEM budget permits).
    partials = pl.pallas_call(
        kernel,
        out_shape=jax.ShapeDtypeStruct((nsplit * 8, LANES), jnp.float32),
        grid_spec=pltpu.PrefetchScalarGridSpec(
            num_scalar_prefetch=0,
            grid=(nsplit, cps),
            in_specs=[
                pl.BlockSpec((block_rows, LANES), in_map),
                pl.BlockSpec((block_rows, LANES), in_map),
            ],
            out_specs=pl.BlockSpec((8, LANES), lambda c, k: (c, 0)),
        ),
        compiler_params=pltpu.CompilerParams(
            dimension_semantics=("parallel", "arbitrary"),
            vmem_limit_bytes=VMEM_LIMIT_BYTES,
        ),
        cost_estimate=pl.CostEstimate(
            flops=6 * rows * LANES,
            transcendentals=0,
            bytes_accessed=bytes_accessed,
        ),
    )(p2, t2)

    return (jnp.sum(partials) + tail_sum) / jnp.float32(n)


def _reference(pred, target, alpha):
    err = pred - target
    return jnp.mean(jnp.where(err > 0, alpha * err ** 2, err ** 2))


if __name__ == "__main__":
    key = jax.random.PRNGKey(0)
    k1, k2, k3, k4 = jax.random.split(key, 4)

    # Small NCHW-like shape consistent with a regression output.
    shape = (2, 4, 16, 16)
    pred = jax.random.normal(k1, shape, dtype=jnp.float32)
    target = jax.random.normal(k2, shape, dtype=jnp.float32)

    loss = asymmetric_mse_loss(pred, target, alpha=ALPHA)
    loss = jax.block_until_ready(loss)
    ref = _reference(pred, target, ALPHA)
    assert jnp.allclose(loss, ref, rtol=1e-6, atol=1e-6), (loss, ref)

    # Second check: non-128-aligned shape to exercise the masked boundary block + tail path.
    shape2 = (3, 5, 17, 13)
    pred2 = jax.random.normal(k3, shape2, dtype=jnp.float32)
    target2 = jax.random.normal(k4, shape2, dtype=jnp.float32)
    loss2 = jax.block_until_ready(asymmetric_mse_loss(pred2, target2, alpha=ALPHA))
    ref2 = _reference(pred2, target2, ALPHA)
    assert jnp.allclose(loss2, ref2, rtol=1e-6, atol=1e-6), (loss2, ref2)

    print("KERNEL_OK")
</pallas_src>

<mosaic_0001>
module attributes {stable_mosaic.version = 11 : i64} {
  func.func @_asym_mse_kernel(%arg0: i32, %arg1: i32, %arg2: memref<8x128xf32, #tpu.memory_space<vmem>>, %arg3: memref<8x128xf32, #tpu.memory_space<vmem>>, %arg4: memref<8x128xf32, #tpu.memory_space<vmem>>) attributes {dimension_semantics = [#tpu.dimension_semantics<parallel>, #tpu.dimension_semantics<arbitrary>], iteration_bounds = array<i64: 1, 2>, scalar_prefetch = 0 : i64, scratch_operands = 0 : i64, tpu.core_type = #tpu.core_type<tc>, window_params = [{transform_indices = @transform_0, window_bounds = array<i64: 8, 128>}, {transform_indices = @transform_1, window_bounds = array<i64: 8, 128>}, {transform_indices = @transform_2, window_bounds = array<i64: 8, 128>}]} {
    %c0_i32 = arith.constant 0 : i32
    %0 = arith.cmpi eq, %arg1, %c0_i32 : i32
    %1 = arith.extui %0 : i1 to i32
    %c0_i32_0 = arith.constant 0 : i32
    %2 = arith.cmpi ne, %1, %c0_i32_0 : i32
    scf.if %2 {
      %cst_11 = arith.constant 0.000000e+00 : f32
      %18 = vector.broadcast %cst_11 : f32 to vector<8x128xf32>
      %c0_12 = arith.constant 0 : index
      %c0_13 = arith.constant 0 : index
      %19 = vector.load %arg4[%c0_12, %c0_13] : memref<8x128xf32, #tpu.memory_space<vmem>>, vector<8x128xf32>
      tpu.vector_store %arg4[%c0_12, %c0_13], %18 {strides = array<i32>} : memref<8x128xf32, #tpu.memory_space<vmem>>, vector<8x128xf32>,
    } else {
    }
    %c0 = arith.constant 0 : index
    %c0_1 = arith.constant 0 : index
    %3 = vector.load %arg2[%c0, %c0_1] : memref<8x128xf32, #tpu.memory_space<vmem>>, vector<8x128xf32>
    %c0_2 = arith.constant 0 : index
    %c0_3 = arith.constant 0 : index
    %4 = vector.load %arg3[%c0_2, %c0_3] : memref<8x128xf32, #tpu.memory_space<vmem>>, vector<8x128xf32>
    %5 = arith.subf %3, %4 : vector<8x128xf32>
    %6 = arith.mulf %5, %5 : vector<8x128xf32>
    %cst = arith.constant 0.000000e+00 : f32
    %7 = vector.broadcast %cst : f32 to vector<8x128xf32>
    %8 = arith.cmpf ogt, %5, %7 : vector<8x128xf32>
    %cst_4 = arith.constant 3.000000e+00 : f32
    %cst_5 = arith.constant 1.000000e+00 : f32
    %9 = vector.broadcast %cst_4 : f32 to vector<8x128xf32>
    %10 = vector.broadcast %cst_5 : f32 to vector<8x128xf32>
    %11 = arith.select %8, %9, %10 : vector<8x128xi1>, vector<8x128xf32>
    %12 = arith.mulf %6, %11 : vector<8x128xf32>
    %c0_6 = arith.constant 0 : index
    %c0_7 = arith.constant 0 : index
    %13 = vector.load %arg4[%c0_6, %c0_7] : memref<8x128xf32, #tpu.memory_space<vmem>>, vector<8x128xf32>
    %14 = vector.shape_cast %12 : vector<8x128xf32> to vector<1x8x128xf32>
    %cst_8 = arith.constant dense<0.000000e+00> : vector<8x128xf32>
    %15 = vector.multi_reduction <add>, %14, %cst_8 [0] : vector<1x8x128xf32> to vector<8x128xf32>
    %16 = arith.addf %13, %15 : vector<8x128xf32>
    %c0_9 = arith.constant 0 : index
    %c0_10 = arith.constant 0 : index
    %17 = vector.load %arg4[%c0_9, %c0_10] : memref<8x128xf32, #tpu.memory_space<vmem>>, vector<8x128xf32>
    tpu.vector_store %arg4[%c0_9, %c0_10], %16 {strides = array<i32>} : memref<8x128xf32, #tpu.memory_space<vmem>>, vector<8x128xf32>,
    return
  }
  func.func @transform_0(%arg0: i32, %arg1: i32) -> (i32, i32) {
    %c2_i32 = arith.constant 2 : i32
    %0 = arith.muli %arg0, %c2_i32 : i32
    %1 = arith.addi %0, %arg1 : i32
    %c0_i32 = arith.constant 0 : i32
    %c0_i32_0 = arith.constant 0 : i32
    return %1, %c0_i32 : i32, i32
  }
  func.func @transform_1(%arg0: i32, %arg1: i32) -> (i32, i32) {
    %c2_i32 = arith.constant 2 : i32
    %0 = arith.muli %arg0, %c2_i32 : i32
    %1 = arith.addi %0, %arg1 : i32
    %c0_i32 = arith.constant 0 : i32
    %c0_i32_0 = arith.constant 0 : i32
    return %1, %c0_i32 : i32, i32
  }
  func.func @transform_2(%arg0: i32, %arg1: i32) -> (i32, i32) {
    %c0_i32 = arith.constant 0 : i32
    %c0_i32_0 = arith.constant 0 : i32
    return %arg0, %c0_i32 : i32, i32
  }
}

</mosaic_0001>

<bundles_post_ra>
// kernel: tpu_custom_call.1
= control target key start
LH: loop header
LB: loop body
LE: loop exit
PB: predicated region body
PF: predicated region fallthrough
CT: control target
= control target key end

     0   :  { %7 = vsyncpa [#allocation3], 0  ;;  %s715_s0 = inlined_call_operand.hbm [shape: f32[16,128], index: 0, kind: input, shape index: {}]   ;;  %s716_s1 = inlined_call_operand.hbm [shape: f32[16,128], index: 1, kind: input, shape index: {}]   ;;  %s717_s2 = inlined_call_operand.hbm [shape: f32[8,128], index: 2, kind: output, shape index: {}]  }
   0x1   :  { %9 = vsyncpa [#allocation3 + $0x1], 0 }
   0x2   :  { %10 = vsyncpa [#allocation6], 0 }
   0x3   :  { %12 = vsyncpa [#allocation6 + $0x1], 0 }
   0x4   :  { %13 = vsyncpa [#allocation4], 0  ;;  %s574_s9 = smov 0   ;;  %s576_s10 = smov 0  }
   0x5   :  { %s578_s11 = smov 0   ;;  %s580_s12 = smov 0  }
   0x6   :  { %s582_s13 = smov 0   ;;  %s584_s14 = smov 0  }
   0x7 LB: > { %s330_s15 = sadd.s32 4294967295, %s552_s14   ;;  %s28_s16 = sadd.s32 1, %s548_s13  ;;  %s552_s14 = sphi %s584_s14, %s19_s14   ;;  %s548_s13 = sphi %s582_s13, %s727_s13   ;;  %s544_s12 = sphi %s580_s12, %s726_s12   ;;  %s540_s11 = sphi %s578_s11, %s725_s11   ;;  %s536_s10 = sphi %s576_s10, %s724_s10   ;;  %s532_s9 = sphi %s574_s9, %s723_s9  }
   0x8   : > { %p29_p0 = scmp.ge.s32.totalorder %s28_s16, 2  ;;  %s42_s17 = sadd.s32 1, %s540_s11 }
   0x9   : > { %p49_p1 = scmp.ne.s32.totalorder %s540_s11, %s536_s10  ;;  %p50_p2 = scmp.eq.s32.totalorder %s552_s14, 0 }
   0xa   : > { %s729_s16 = smov (%p29_p0, %s28_s16), 0  ;;  %p55_p4 = scmp.ne.s32.totalorder %s536_s10, %s532_s9 }
   0xb   : > { %p610_p3 = por %p50_p2, %p49_p1  ;;  %s39_s19 = ssub.s32 %s548_s13, %s729_s16 }
   0xc   : > { %p56_p5 = scmp.eq.s32.totalorder %s330_s15, 0  ;;  %p40_p6 = scmp.eq.s32.totalorder %s39_s19, 0 }
   0xd   : > { %p360_p8 = scmp.lt.s32.totalorder %s552_s14, 2  ;;  %s628_s22 = sand.u32 1, %s540_s11  }
   0xe   : > { %p619_p7 = por %p56_p5, %p55_p4  ;;  %s334_s23 = sshll.u32 %s548_s13, 7 }
   0xf   : > { %s625_s21 = scalar_select %p40_p6, %s540_s11, %s42_s17  }
  0x10   : > { %s333_s24 = sshll.u32 %s628_s22, 3  ;;  %s146_s27 = scalar_lea.hbm %s715_s0, %s334_s23 }
  0x11   : > { %s139_s28 = scalar_lea.vmem [#allocation2], %s333_s24  ;;  %p637_p9 = pnand %p360_p8, %p610_p3 }
  0x12   : > { %s148_s29 = sshll.u32 %s139_s28, 4  ;;  %p337_p10 = scmp.ge.s32.totalorder %s552_s14, 1  ;;  %s149_s29 = int_to_ptr.vmem [resolvable:$true] %s148_s29 }
  0x13   : > { %p173_p11 = scmp.lt.s32.totalorder %s552_s14, 3  ;;  %s136_s3 = scalar_lea.sflag [#allocation3], %s628_s22 }
  0x14   : > { %p416_p12 = pneg %p637_p9  ;;  %s427_s4 = scalar_lea.vmem %s149_s29, 128 }
  0x15   : > { %p428_p13 = scmp.ne.s32.totalorder %s149_s29, %s427_s4  ;;  %s554_s5 = smov [#allocation2]  }
  0x16   : > { %s432_s6 = sshll.u32 %s554_s5, 4  ;;  %s433_s6 = int_to_ptr.vmem [resolvable:$false] %s432_s6 }
  0x17   : > { %p430_p0 = pnand %p428_p13, %p416_p12  ;;  %s434_s7 = scalar_lea.vmem %s433_s6, 256 }
  0x18   : > { %p435_p2 = scmp.lt.s32.totalorder %s149_s29, %s433_s6  ;;  %p436_p3 = scmp.lt.s32.totalorder %s434_s7, %s427_s4 }
  0x19   : > { %p431_p1 = pneg %p430_p0 }
  0x1a   : > { %p437_p4 = por %p436_p3, %p435_p2 }
  0x1c   : > { %p438_p5 = pnand %p437_p4, %p431_p1 }
  0x1e   : > { %441 = shalt.err (!%p438_p5)
}
  0x1f   : > { %356 = dma.hbm_to_vmem [thread:$0]  (!%p637_p9), %s146_s27, 128, %s149_s29, %s136_s3  }
  0x20   : > { %p655_p6 = pnand %p337_p10, %p173_p11  ;;  %s166_s18 = scalar_lea.hbm %s716_s1, %s334_s23 }
  0x21   : > { %s159_s19 = scalar_lea.vmem [#allocation5], %s333_s24  ;;  %s156_s26 = scalar_lea.sflag [#allocation6], %s628_s22 }
  0x22   : > { %s168_s25 = sshll.u32 %s159_s19, 4  ;;  %s555_s27 = smov [#allocation5]   ;;  %s169_s25 = int_to_ptr.vmem [resolvable:$true] %s168_s25 }
  0x23   : > { %s455_s28 = scalar_lea.vmem %s169_s25, 128  ;;  %s460_s29 = sshll.u32 %s555_s27, 4  ;;  %s461_s29 = int_to_ptr.vmem [resolvable:$false] %s460_s29 }
  0x24   : > { %p456_p8 = scmp.ne.s32.totalorder %s169_s25, %s455_s28  ;;  %s462_s3 = scalar_lea.vmem %s461_s29, 256 }
  0x25   : > { %p463_p10 = scmp.lt.s32.totalorder %s169_s25, %s461_s29  ;;  %p464_p11 = scmp.lt.s32.totalorder %s462_s3, %s455_s28 }
  0x26   : > { %p458_p13 = pnand %p456_p8, %p416_p12 }
  0x27   : > { %p465_p1 = por %p464_p11, %p463_p10 }
  0x28   : > { %p459_p0 = pneg %p458_p13 }
  0x2a   : > { %p466_p2 = pnand %p465_p1, %p459_p0 }
  0x2c   : > { %469 = shalt.err (!%p466_p2)
}
  0x2d   : > { %359 = dma.hbm_to_vmem [thread:$0]  (!%p637_p9), %s166_s18, 128, %s169_s25, %s156_s26  }
  0x2e   : > { %177 = sbr.rel (%p655_p6) target bundleno = 78 (0x4e), region = 28  ;;  %s179_s22 = sand.u32 (!%p655_p6), 1, %s536_s10  }
  0x2f   : > { %s338_s23 = sshll.u32 (!%p655_p6), %s179_s22, 3  ;;  %s180_s24 = scalar_lea.sflag (!%p655_p6), [#allocation3], %s179_s22 }
  0x30   : > { %s183_s4 = scalar_lea.vmem (!%p655_p6), [#allocation2], %s338_s23 }
  0x33   : > { %519 = dma.done.wait (%p619_p7), %s180_s24, 128  }
  0x34   : > { %521 = vsyncadd (%p619_p7), %s180_s24, 4294967168  ;;  %s189_s5 = scalar_lea.sflag [#allocation6], %s179_s22  ;;  %s192_s6 = scalar_lea.vmem [#allocation5], %s338_s23 }
  0x35   : > { %523 = dma.done.wait (%p619_p7), %s189_s5, 128  }
  0x36   : > { %525 = vsyncadd (%p619_p7), %s189_s5, 4294967168  ;;  %p340_p9 = scmp.ne.s32.totalorder %s544_s12, 0 }
  0x38   : > { %220 = sbr.rel (%p340_p9) target bundleno = 63 (0x3f), region = 40 }
  0x3d   : > { %v556_v0 = vmov 0.0  }
  0x3e   : > { %221 = vst [vmem:[#allocation7] sm:$0xff] %v556_v0 }
  0x3f PF: > { %v222_v1 = vld [vmem:[%s183_s4] sm:$0xff]  ;;  %v223_v2 = vld [vmem:[%s192_s6] sm:$0xff]  ;;  %v557_v5 = vmov 1.0   ;;  %s558_s30 = smov [#allocation7]   ;;  %p682_p7 = scmp.eq.s32.totalorder %s330_s15, 1 }
  0x40   : > { %v224_v3 = vsub.f32 %v222_v1, %v223_v2  ;;  %s242_s7 = sshll.u32 %s558_s30, 4  ;;  %s243_s7 = int_to_ptr.vmem [resolvable:$true] %s242_s7 }
  0x41   : > { %s470_s12 = scalar_lea.vmem %s243_s7, 128  ;;  %p477_p5 = scmp.lt.s32.totalorder %s243_s7, %s243_s7 }
  0x42   : > { %v225_v4 = vmul.f32 %v224_v3, %v224_v3  ;;  %vm226_vm0 = vcmp.gt.f32.partialorder %v224_v3, 0.0  ;;  %p471_p12 = scmp.ne.s32.totalorder %s243_s7, %s470_s12  ;;  %p478_p6 = scmp.lt.s32.totalorder %s470_s12, %s470_s12 }
  0x43   : > { %v227_v6 = vsel %vm226_vm0, 3.0, %v557_v5 }
  0x44   : > { %v228_v8 = vmul.f32 %v227_v6, %v225_v4  ;;  %p472_p3 = pnand %p471_p12, %p682_p7  ;;  %p479_p8 = por %p478_p6, %p477_p5 }
  0x45   : > { %v229_v7 = vld [vmem:[#allocation7] sm:$0xff] }
  0x46   : > { %v231_v9 = vadd.f32 %v229_v7, %v228_v8  ;;  %p473_p4 = pneg %p472_p3 }
  0x48   : > { %232 = vst [vmem:[#allocation7] sm:$0xff] %v231_v9  ;;  %p480_p13 = pnand %p479_p8, %p473_p4 }
  0x4a   : > { %483 = shalt.err (!%p480_p13)
}
  0x4b   : > { %350 = dma.vmem_to_hbm [thread:$0]  (%p682_p7), %s243_s7, 128, %s717_s2, [#allocation4]  }
  0x4c   : > { %527 = dma.done.wait (%p682_p7), [#allocation4], 128  }
  0x4d   : > { %529 = vsyncadd (%p682_p7), [#allocation4], 4294967168 }
  0x4e PF: > { %s19_s14 = sadd.s32 1, %s552_s14   ;;  %s723_s9 = smov %s536_s10 }
  0x4f   : > { %p16_p0 = scmp.ge.s32.totalorder %s19_s14, 4   ;;  %s724_s10 = smov %s540_s11 }
  0x50   : > { %s725_s11 = smov %s625_s21  ;;  %s726_s12 = smov %s548_s13 }
  0x51   : > { %s727_s13 = smov %s729_s16  ;;  %18 = sbr.rel (!%p16_p0) target bundleno = 7 (0x7), region = 83 }
  0x56   :  { %255 = vsyncpa [#allocation3], 1 }
  0x57   :  { %257 = vsyncpa [#allocation3 + $0x1], 1 }
  0x58   :  { %258 = vsyncpa [#allocation6], 1 }
  0x59   :  { %260 = vsyncpa [#allocation6 + $0x1], 1 }
  0x5a   :  { %261 = vsyncpa [#allocation4], 1 }
  0x5b   :  { %263 = vsyncpa [#allocation4 + $0x1], 1 }

</bundles_post_ra>
